<compile_context>
chip_gen: v6e
topology: v6e:2x2x1
jax: 0.10.0
libtpu: 0.0.40
codegen_flags: <defaults>
</compile_context>

<pallas_src>
import functools
import math

import jax
import jax.numpy as jnp
from jax.experimental import pallas as pl
from jax.experimental.pallas import tpu as pltpu


# ----------------------------------------------------------------------------
# Fused kernel: conv1 + bias + ReLU + conv2 + bias + residual, one lane-packed
# group of images per grid step.  Everything stays in vregs (no scratch).
# ----------------------------------------------------------------------------
def _fused_resblock_kernel(x_ref, b1w_ref, b1_ref, b2w_ref, b2_ref, o_ref, *,
                           H, K, wrap_h, mm_dtype):
    """
    x_ref:   (H, L)     L = lane_pack * W * C, input rows (f32)
    b1w_ref: (K*L, L)   conv1 weights with width taps, width boundary condition
                        and lane packing folded in
    b1_ref:  (1, L)     conv1 bias tiled over (lane_pack, W)
    b2w_ref: (K*L, L)   conv2 folded weights
    b2_ref:  (1, L)     conv2 bias
    o_ref:   (H, L)     output rows
    """
    pad = K // 2

    def taps(img):
        # (H, L) -> (H, K*L).  Column block kh holds the image shifted
        # vertically by (kh - pad) with the requested boundary condition, so a
        # single matmul applies all K vertical taps (contraction depth K*L).
        if pad == 0:
            return img
        if wrap_h:
            top = img[H - pad:, :]          # periodic: last rows wrap to top
            bot = img[:pad, :]
        else:
            top = jnp.zeros((pad, img.shape[1]), img.dtype)
            bot = top
        xe = jnp.concatenate([top, img, bot], axis=0)        # (H + 2*pad, L)
        return jnp.concatenate([xe[kh:kh + H, :] for kh in range(K)], axis=1)

    def conv(img, bw_ref, bias_ref):
        # One MXU matmul per conv: (H, K*L) @ (K*L, L), f32 accumulation.
        t = taps(img).astype(mm_dtype)
        return jnp.dot(t, bw_ref[...],
                       preferred_element_type=jnp.float32) + bias_ref[...]

    x = x_ref[...]
    if x.dtype != jnp.float32:              # no dead cast when already f32
        x = x.astype(jnp.float32)

    y = jnp.maximum(conv(x, b1w_ref, b1_ref), 0.0)    # conv1 + bias + ReLU
    out = conv(y, b2w_ref, b2_ref) + x                # conv2 + bias + residual
    o_ref[...] = out.astype(o_ref.dtype)


# ----------------------------------------------------------------------------
# Wrapper-side helpers
# ----------------------------------------------------------------------------
def _parse_padding(padding_type):
    """Per-axis boundary mode -> (wrap_h, wrap_w) booleans."""
    if isinstance(padding_type, str):
        pt_h = pt_w = padding_type
    else:
        pt_h, pt_w = padding_type

    def is_wrap(p):
        if p in ("periodic", "circular", "wrap"):
            return True
        if p in ("zero", "zeros", "constant"):
            return False
        # TODO(synk): reflect/replicate boundary modes are not implemented.
        raise ValueError(f"unsupported padding_type: {p}")

    return is_wrap(pt_h), is_wrap(pt_w)


def _choose_lane_pack(N, WC):
    """# of images packed along lanes so the output lane width reaches 128."""
    if WC % 128 == 0 or 128 % WC != 0:
        return 1
    return max(1, math.gcd(N, 128 // WC))


def _fold_weights(w_kkio, W, pad, wrap_w, lane_pack):
    """(K, K, Cin, Cout) -> (K*P*W*Cin, P*W*Cout) folded matmul operand.

    Horizontal taps, the channel contraction, the width boundary condition
    (periodic wrap or zeros) and the lane packing of P images (block-diagonal)
    are all folded in, so the kernel never builds a width-padded image.
    """
    K, _, Cin, Cout = w_kkio.shape
    wi = jnp.arange(W)[:, None, None]                    # input width index
    wo = jnp.arange(W)[None, :, None]                    # output width index
    kw = jnp.arange(K)[None, None, :]                    # horizontal tap
    src = wo + kw - pad
    if wrap_w:
        hit = wi == (src % W)
    else:
        hit = (wi == src) & (src >= 0) & (src < W)
    mask = hit.astype(w_kkio.dtype)                      # (W, W, K)
    B = jnp.einsum('pwk,hkio->hpiwo', mask, w_kkio)      # (K, W, Cin, W, Cout)
    B = B.reshape(K, W * Cin, W * Cout)
    if lane_pack > 1:                                    # block-diag over images
        eye = jnp.eye(lane_pack, dtype=B.dtype)
        B = jnp.einsum('pq,hac->hpaqc', eye, B).reshape(
            K, lane_pack * W * Cin, lane_pack * W * Cout)
    return B.reshape(K * lane_pack * W * Cin, lane_pack * W * Cout)


# ----------------------------------------------------------------------------
# pallas_call wrappers (NHWC entry for chaining + NCHW adapter matching torch)
# ----------------------------------------------------------------------------
def aeflow_v2_res_block_nhwc(x_nhwc, params, padding_type, *, matmul_dtype=None):
    """Fused ResBlock forward on NHWC input. Preferred entry for chaining."""
    N, H, W, C = x_nhwc.shape
    w1, b1, w2, b2 = params["w1"], params["b1"], params["w2"], params["b2"]
    K = w1.shape[0]
    pad = K // 2
    wrap_h, wrap_w = _parse_padding(padding_type)
    mm_dtype = x_nhwc.dtype if matmul_dtype is None else matmul_dtype

    WC = W * C
    P = _choose_lane_pack(N, WC)      # images packed along lanes (2 for W*C=64)
    G = N // P                        # grid length
    L = P * WC                        # lane width of the kernel block

    # (N,H,W,C) -> (G, H, P*W*C): P images side by side on the lane axis so the
    # output is lane-dense (multiple of 128 -> unmasked stores, full MXU N).
    xg = x_nhwc.reshape(G, P, H, WC).transpose(0, 2, 1, 3).reshape(G, H, L)

    B1 = _fold_weights(w1, W, pad, wrap_w, P).astype(mm_dtype)
    B2 = _fold_weights(w2, W, pad, wrap_w, P).astype(mm_dtype)
    b1r = jnp.tile(b1, P * W).reshape(1, L).astype(jnp.float32)
    b2r = jnp.tile(b2, P * W).reshape(1, L).astype(jnp.float32)

    kernel = functools.partial(_fused_resblock_kernel, H=H, K=K,
                               wrap_h=wrap_h, mm_dtype=mm_dtype)

    out = pl.pallas_call(
        kernel,
        out_shape=jax.ShapeDtypeStruct((G, H, L), x_nhwc.dtype),
        grid=(G,),
        in_specs=[
            pl.BlockSpec((None, H, L), lambda g: (g, 0, 0)),   # image group
            pl.BlockSpec((K * L, L), lambda g: (0, 0)),        # conv1 weights
            pl.BlockSpec((1, L), lambda g: (0, 0)),            # conv1 bias
            pl.BlockSpec((K * L, L), lambda g: (0, 0)),        # conv2 weights
            pl.BlockSpec((1, L), lambda g: (0, 0)),            # conv2 bias
        ],
        out_specs=pl.BlockSpec((None, H, L), lambda g: (g, 0, 0)),
        compiler_params=pltpu.CompilerParams(
            # grid shards across v7x's 2 TCs when G >= 2; on single-TC v5e/v6e
            # the lane packing already folds the batch into fewer, fatter steps.
            dimension_semantics=("parallel",),
            vmem_limit_bytes=32 * 1024 * 1024,
        ),
    )(xg, B1, b1r, B2, b2r)

    return out.reshape(G, H, P, WC).transpose(0, 2, 1, 3).reshape(N, H, W, C)


def aeflow_v2_res_block(x_nchw, params, padding_type, *, matmul_dtype=None):
    """NCHW adapter matching the PyTorch module interface."""
    x = jnp.transpose(x_nchw, (0, 2, 3, 1))                   # NCHW -> NHWC
    y = aeflow_v2_res_block_nhwc(x, params, padding_type,
                                 matmul_dtype=matmul_dtype)
    return jnp.transpose(y, (0, 3, 1, 2))                     # NHWC -> NCHW


# ----------------------------------------------------------------------------
# Deterministic parameter init (PyTorch Conv2d-style uniform bounds)
# ----------------------------------------------------------------------------
def init_params(key, hidden_channels, kernel_size):
    C, K = hidden_channels, kernel_size
    bound = 1.0 / jnp.sqrt(jnp.float32(C * K * K))
    ks = jax.random.split(key, 4)
    # generate in PyTorch layout (Cout, Cin, K, K), then move to (K, K, Cin, Cout)
    w1 = jax.random.uniform(ks[0], (C, C, K, K), jnp.float32, -bound, bound)
    w2 = jax.random.uniform(ks[1], (C, C, K, K), jnp.float32, -bound, bound)
    b1 = jax.random.uniform(ks[2], (C,), jnp.float32, -bound, bound)
    b2 = jax.random.uniform(ks[3], (C,), jnp.float32, -bound, bound)
    to_kkio = lambda w: jnp.transpose(w, (2, 3, 1, 0))
    return {"w1": to_kkio(w1), "b1": b1, "w2": to_kkio(w2), "b2": b2}


# ----------------------------------------------------------------------------
# Pure-JAX reference (lax conv) for the correctness check
# ----------------------------------------------------------------------------
def _np_mode(p):
    if p in ("periodic", "circular", "wrap"):
        return "wrap"
    if p in ("zero", "zeros", "constant"):
        return "constant"
    raise ValueError(f"unsupported padding_type: {p}")


def _pad_custom_bd(x_nhwc, pad, padding_type):
    if isinstance(padding_type, str):
        pt_h = pt_w = padding_type
    else:
        pt_h, pt_w = padding_type
    x = jnp.pad(x_nhwc, ((0, 0), (pad, pad), (0, 0), (0, 0)), mode=_np_mode(pt_h))
    x = jnp.pad(x, ((0, 0), (0, 0), (pad, pad), (0, 0)), mode=_np_mode(pt_w))
    return x


def _ref_block(x_nchw, params, padding_type):
    pad = params["w1"].shape[0] // 2

    def conv(x_nhwc, w, b):
        xp = _pad_custom_bd(x_nhwc, pad, padding_type)
        y = jax.lax.conv_general_dilated(
            xp, w, window_strides=(1, 1), padding="VALID",
            dimension_numbers=("NHWC", "HWIO", "NHWC"))
        return y + b

    x = jnp.transpose(x_nchw, (0, 2, 3, 1))
    y = jnp.maximum(conv(x, params["w1"], params["b1"]), 0.0)
    y = conv(y, params["w2"], params["b2"]) + x
    return jnp.transpose(y, (0, 3, 1, 2))


if __name__ == "__main__":
    # Small shapes consistent with the module: batch=2, hidden_channels=4,
    # spatial=16x16, kernel_size=3.
    N, C, H, W = 2, 4, 16, 16
    kernel_size = 3

    key = jax.random.PRNGKey(0)
    kx, kp = jax.random.split(key)
    x = jax.random.normal(kx, (N, C, H, W), jnp.float32)
    params = init_params(kp, C, kernel_size)

    # Periodic boundary, exact-semantics path (f32 MXU operands).
    pt = ("periodic", "periodic")
    out = jax.block_until_ready(aeflow_v2_res_block(x, params, pt))
    ref = jax.block_until_ready(_ref_block(x, params, pt))
    assert out.shape == (N, C, H, W)
    assert jnp.allclose(out, ref, atol=1e-3, rtol=1e-3), "periodic f32 mismatch"

    # Perf path: bf16 MXU operands, f32 accumulation + f32 epilogue.
    out_bf = jax.block_until_ready(
        aeflow_v2_res_block(x, params, pt, matmul_dtype=jnp.bfloat16))
    assert jnp.allclose(out_bf, ref, atol=1e-1, rtol=1e-1), "periodic bf16 mismatch"

    # Zeros boundary path (halo handled by zero-fill + unwrapped weight fold).
    ptz = ("zeros", "zeros")
    out_z = jax.block_until_ready(aeflow_v2_res_block(x, params, ptz))
    ref_z = jax.block_until_ready(_ref_block(x, params, ptz))
    assert jnp.allclose(out_z, ref_z, atol=1e-3, rtol=1e-3), "zeros mismatch"

    print("KERNEL_OK")
</pallas_src>

<mosaic_0001>
module attributes {stable_mosaic.version = 11 : i64} {
  func.func @_fused_resblock_kernel(%arg0: i32, %arg1: memref<1x16x128xf32, #tpu.memory_space<vmem>>, %arg2: memref<384x128xf32, #tpu.memory_space<vmem>>, %arg3: memref<1x128xf32, #tpu.memory_space<vmem>>, %arg4: memref<384x128xf32, #tpu.memory_space<vmem>>, %arg5: memref<1x128xf32, #tpu.memory_space<vmem>>, %arg6: memref<1x16x128xf32, #tpu.memory_space<vmem>>) attributes {dimension_semantics = [#tpu.dimension_semantics<parallel>], iteration_bounds = array<i64: 1>, scalar_prefetch = 0 : i64, scratch_operands = 0 : i64, tpu.core_type = #tpu.core_type<tc>, window_params = [{transform_indices = @transform_0, window_bounds = array<i64: 1, 16, 128>}, {pipeline_mode = #tpu.pipeline_mode<synchronous>, transform_indices = @transform_1, window_bounds = array<i64: 384, 128>}, {pipeline_mode = #tpu.pipeline_mode<synchronous>, transform_indices = @transform_2, window_bounds = array<i64: 1, 128>}, {pipeline_mode = #tpu.pipeline_mode<synchronous>, transform_indices = @transform_3, window_bounds = array<i64: 384, 128>}, {pipeline_mode = #tpu.pipeline_mode<synchronous>, transform_indices = @transform_4, window_bounds = array<i64: 1, 128>}, {transform_indices = @transform_5, window_bounds = array<i64: 1, 16, 128>}]} {
    %c0 = arith.constant 0 : index
    %c0_0 = arith.constant 0 : index
    %c0_1 = arith.constant 0 : index
    %0 = vector.load %arg1[%c0, %c0_0, %c0_1] : memref<1x16x128xf32, #tpu.memory_space<vmem>>, vector<1x16x128xf32>
    %1 = vector.shape_cast %0 : vector<1x16x128xf32> to vector<16x128xf32>
    %2 = vector.extract_strided_slice %1 {offsets = [15, 0], sizes = [1, 128], strides = [1, 1]} : vector<16x128xf32> to vector<1x128xf32>
    %3 = vector.extract_strided_slice %1 {offsets = [0, 0], sizes = [1, 128], strides = [1, 1]} : vector<16x128xf32> to vector<1x128xf32>
    %4 = tpu.concatenate %2, %1, %3 in 0 : vector<1x128xf32>, vector<16x128xf32>, vector<1x128xf32> -> vector<18x128xf32>
    %5 = vector.extract_strided_slice %4 {offsets = [0, 0], sizes = [16, 128], strides = [1, 1]} : vector<18x128xf32> to vector<16x128xf32>
    %6 = vector.extract_strided_slice %4 {offsets = [1, 0], sizes = [16, 128], strides = [1, 1]} : vector<18x128xf32> to vector<16x128xf32>
    %7 = vector.extract_strided_slice %4 {offsets = [2, 0], sizes = [16, 128], strides = [1, 1]} : vector<18x128xf32> to vector<16x128xf32>
    %8 = tpu.concatenate %5, %6, %7 in 1 : vector<16x128xf32>, vector<16x128xf32>, vector<16x128xf32> -> vector<16x384xf32>
    %c0_2 = arith.constant 0 : index
    %c0_3 = arith.constant 0 : index
    %9 = vector.load %arg2[%c0_2, %c0_3] : memref<384x128xf32, #tpu.memory_space<vmem>>, vector<384x128xf32>
    %cst = arith.constant dense<0.000000e+00> : vector<16x128xf32>
    %10 = tpu.matmul %8, %9, %cst {dimension_numbers = #tpu.dot_dimension_numbers<[1], [0], [0], [1], [0, 0, 1, 1], [], []>} : vector<16x384xf32>, vector<384x128xf32>, vector<16x128xf32> -> vector<16x128xf32>
    %c0_4 = arith.constant 0 : index
    %c0_5 = arith.constant 0 : index
    %11 = vector.load %arg3[%c0_4, %c0_5] : memref<1x128xf32, #tpu.memory_space<vmem>>, vector<1x128xf32>
    %12 = vector.broadcast %11 : vector<1x128xf32> to vector<16x128xf32>
    %13 = arith.addf %10, %12 : vector<16x128xf32>
    %cst_6 = arith.constant 0.000000e+00 : f32
    %14 = vector.broadcast %cst_6 : f32 to vector<16x128xf32>
    %15 = arith.maximumf %13, %14 : vector<16x128xf32>
    %16 = vector.extract_strided_slice %15 {offsets = [15, 0], sizes = [1, 128], strides = [1, 1]} : vector<16x128xf32> to vector<1x128xf32>
    %17 = vector.extract_strided_slice %15 {offsets = [0, 0], sizes = [1, 128], strides = [1, 1]} : vector<16x128xf32> to vector<1x128xf32>
    %18 = tpu.concatenate %16, %15, %17 in 0 : vector<1x128xf32>, vector<16x128xf32>, vector<1x128xf32> -> vector<18x128xf32>
    %19 = vector.extract_strided_slice %18 {offsets = [0, 0], sizes = [16, 128], strides = [1, 1]} : vector<18x128xf32> to vector<16x128xf32>
    %20 = vector.extract_strided_slice %18 {offsets = [1, 0], sizes = [16, 128], strides = [1, 1]} : vector<18x128xf32> to vector<16x128xf32>
    %21 = vector.extract_strided_slice %18 {offsets = [2, 0], sizes = [16, 128], strides = [1, 1]} : vector<18x128xf32> to vector<16x128xf32>
    %22 = tpu.concatenate %19, %20, %21 in 1 : vector<16x128xf32>, vector<16x128xf32>, vector<16x128xf32> -> vector<16x384xf32>
    %c0_7 = arith.constant 0 : index
    %c0_8 = arith.constant 0 : index
    %23 = vector.load %arg4[%c0_7, %c0_8] : memref<384x128xf32, #tpu.memory_space<vmem>>, vector<384x128xf32>
    %cst_9 = arith.constant dense<0.000000e+00> : vector<16x128xf32>
    %24 = tpu.matmul %22, %23, %cst_9 {dimension_numbers = #tpu.dot_dimension_numbers<[1], [0], [0], [1], [0, 0, 1, 1], [], []>} : vector<16x384xf32>, vector<384x128xf32>, vector<16x128xf32> -> vector<16x128xf32>
    %c0_10 = arith.constant 0 : index
    %c0_11 = arith.constant 0 : index
    %25 = vector.load %arg5[%c0_10, %c0_11] : memref<1x128xf32, #tpu.memory_space<vmem>>, vector<1x128xf32>
    %26 = vector.broadcast %25 : vector<1x128xf32> to vector<16x128xf32>
    %27 = arith.addf %24, %26 : vector<16x128xf32>
    %28 = arith.addf %27, %1 : vector<16x128xf32>
    %c0_12 = arith.constant 0 : index
    %c0_13 = arith.constant 0 : index
    %c0_14 = arith.constant 0 : index
    %29 = vector.load %arg6[%c0_12, %c0_13, %c0_14] : memref<1x16x128xf32, #tpu.memory_space<vmem>>, vector<1x16x128xf32>
    %30 = vector.shape_cast %29 : vector<1x16x128xf32> to vector<16x128xf32>
    %31 = vector.shape_cast %28 : vector<16x128xf32> to vector<1x16x128xf32>
    tpu.vector_store %arg6[%c0_12, %c0_13, %c0_14], %31 {strides = array<i32>} : memref<1x16x128xf32, #tpu.memory_space<vmem>>, vector<1x16x128xf32>,
    return
  }
  func.func @transform_0(%arg0: i32) -> (i32, i32, i32) {
    %c0_i32 = arith.constant 0 : i32
    %c0_i32_0 = arith.constant 0 : i32
    %c0_i32_1 = arith.constant 0 : i32
    return %arg0, %c0_i32, %c0_i32_0 : i32, i32, i32
  }
  func.func @transform_1(%arg0: i32) -> (i32, i32) {
    %c0_i32 = arith.constant 0 : i32
    %c0_i32_0 = arith.constant 0 : i32
    %c0_i32_1 = arith.constant 0 : i32
    return %c0_i32, %c0_i32_0 : i32, i32
  }
  func.func @transform_2(%arg0: i32) -> (i32, i32) {
    %c0_i32 = arith.constant 0 : i32
    %c0_i32_0 = arith.constant 0 : i32
    %c0_i32_1 = arith.constant 0 : i32
    return %c0_i32, %c0_i32_0 : i32, i32
  }
  func.func @transform_3(%arg0: i32) -> (i32, i32) {
    %c0_i32 = arith.constant 0 : i32
    %c0_i32_0 = arith.constant 0 : i32
    %c0_i32_1 = arith.constant 0 : i32
    return %c0_i32, %c0_i32_0 : i32, i32
  }
  func.func @transform_4(%arg0: i32) -> (i32, i32) {
    %c0_i32 = arith.constant 0 : i32
    %c0_i32_0 = arith.constant 0 : i32
    %c0_i32_1 = arith.constant 0 : i32
    return %c0_i32, %c0_i32_0 : i32, i32
  }
  func.func @transform_5(%arg0: i32) -> (i32, i32, i32) {
    %c0_i32 = arith.constant 0 : i32
    %c0_i32_0 = arith.constant 0 : i32
    %c0_i32_1 = arith.constant 0 : i32
    return %arg0, %c0_i32, %c0_i32_0 : i32, i32, i32
  }
}

</mosaic_0001>

<bundles_post_ra>
// kernel: tpu_custom_call.1
= control target key start
LH: loop header
LB: loop body
LE: loop exit
PB: predicated region body
PF: predicated region fallthrough
CT: control target
= control target key end

     0   :  { %10 = vsyncpa [#allocation3], 0  ;;  %s912_s0 = inlined_call_operand.hbm [shape: f32[1,16,128], index: 0, kind: input, shape index: {}]   ;;  %s913_s1 = inlined_call_operand.hbm [shape: f32[384,128], index: 1, kind: input, shape index: {}]   ;;  %s914_s2 = inlined_call_operand.vmem [shape: f32[1,128], index: 2, kind: input, shape index: {}]   ;;  %s915_s3 = inlined_call_operand.hbm [shape: f32[384,128], index: 3, kind: input, shape index: {}]   ;;  %s916_s4 = inlined_call_operand.vmem [shape: f32[1,128], index: 4, kind: input, shape index: {}]   ;;  %s917_s5 = inlined_call_operand.hbm [shape: f32[1,16,128], index: 5, kind: output, shape index: {}]  }
   0x1   :  { %11 = vsyncpa [#allocation6], 0 }
   0x2   :  { %12 = vsyncpa [#allocation4], 0  ;;  %s821_s18 = smov [#allocation5]   ;;  %s822_s20 = smov [#allocation2]  }
   0x3   :  { %s30_s19 = sshll.u32 %s821_s18, 4  ;;  %s18_s21 = sshll.u32 %s822_s20, 4  ;;  %s31_s19 = int_to_ptr.vmem [resolvable:$true] %s30_s19  ;;  %s19_s21 = int_to_ptr.vmem [resolvable:$true] %s18_s21 }
   0x4   :  { %s743_s22 = scalar_lea.vmem %s31_s19, 6144  ;;  %p748_p1 = scmp.lt.s32.totalorder %s31_s19, %s31_s19 }
   0x5   :  { %p744_p0 = scmp.ne.s32.totalorder %s31_s19, %s743_s22  ;;  %p749_p2 = scmp.lt.s32.totalorder %s743_s22, %s743_s22 }
   0x7   :  { %p750_p3 = por %p749_p2, %p748_p1 }
   0x9   :  { %p751_p4 = pnand %p750_p3, %p744_p0 }
   0xb   :  { %754 = shalt.err (!%p751_p4)
}
   0xc   :  { %s823_s23 = smov 128   ;;  %s824_s24 = smov 8  }
   0xd   :  { %36 = dma.hbm_to_vmem [thread:$0]  %s913_s1, 6144, %s31_s19, [#allocation6], %s823_s23, %s823_s23, %s824_s24  }
   0xe   :  { %s763_s27 = scalar_lea.vmem %s19_s21, 256  ;;  %p768_p6 = scmp.lt.s32.totalorder %s19_s21, %s19_s21 }
   0xf   :  { %p764_p5 = scmp.ne.s32.totalorder %s19_s21, %s763_s27  ;;  %p769_p7 = scmp.lt.s32.totalorder %s763_s27, %s763_s27 }
  0x11   :  { %p770_p8 = por %p769_p7, %p768_p6 }
  0x13   :  { %p771_p9 = pnand %p770_p8, %p764_p5 }
  0x15   :  { %774 = shalt.err (!%p771_p9)
}
  0x16   :  { %24 = dma.hbm_to_vmem [thread:$0]  %s912_s0, 256, %s19_s21, [#allocation3], %s823_s23, %s823_s23, %s824_s24  }
  0x17   :  { %s825_s30 = smov [#allocation7]  }
  0x18   :  { %s44_s6 = sshll.u32 %s825_s30, 4  ;;  %s45_s6 = int_to_ptr.vmem [resolvable:$true] %s44_s6 }
  0x19   :  { %s783_s7 = scalar_lea.vmem %s45_s6, 6144  ;;  %p788_p11 = scmp.lt.s32.totalorder %s45_s6, %s45_s6 }
  0x1a   :  { %p784_p10 = scmp.ne.s32.totalorder %s45_s6, %s783_s7  ;;  %p789_p12 = scmp.lt.s32.totalorder %s783_s7, %s783_s7 }
  0x1c   :  { %p790_p13 = por %p789_p12, %p788_p11 }
  0x1e   :  { %p791_p0 = pnand %p790_p13, %p784_p10 }
  0x20   :  { %794 = shalt.err (!%p791_p0)
}
  0x21   :  { %50 = dma.hbm_to_vmem [thread:$0]  %s915_s3, 6144, %s45_s6, [#allocation6], %s823_s23, %s823_s23, %s824_s24  }
  0x22   :  { %815 = dma.done.wait [#allocation3], 256  }
  0x23   :  { %816 = vsyncadd [#allocation3], 4294967040 }
  0x24   :  { %817 = dma.done.wait [#allocation6], 12288  }
  0x25   :  { %818 = vsyncadd [#allocation6], 4294955008  ;;  %v120_v0 = vld [vmem:[#allocation5 + $0xf8] sm:$0xff]  ;;  %v119_v2 = vld [vmem:[#allocation5 + $0xf0] sm:$0xff]  ;;  %vm68_vm0 = vcmask 1040384   ;;  %vm75_vm1 = vcmask 1046528  }
  0x26   :  { %v104_v1 = vld [vmem:[#allocation5 + $0x78] sm:$0xff]  ;;  %547 = vmatprep.subr.mxu0 %v120_v0  ;;  %v103_v3 = vld [vmem:[#allocation5 + $0x70] sm:$0xff]  ;;  %v118_v5 = vld [vmem:[#allocation5 + $0xe8] sm:$0xff]  ;;  %vm82_vm2 = vcmask 1045504   ;;  %s826_s10 = smov [#allocation8]  }
  0x27   :  { %v136_v4 = vld [vmem:[#allocation5 + $0x178] sm:$0xff]  ;;  %548 = vmatpush3.msra.mxu0 %v104_v1  ;;  %v135_v6 = vld [vmem:[#allocation5 + $0x170] sm:$0xff]  ;;  %v102_v7 = vld [vmem:[#allocation5 + $0x68] sm:$0xff]  ;;  %s532_s11 = sshll.u32 %s826_s10, 4  ;;  %s533_s11 = int_to_ptr.vmem [resolvable:$true] %s532_s11 }
  0x28   :  { %659 = vmatprep.subr.mxu1 %v136_v4  ;;  %549 = vmatprep.subr.mxu0 %v119_v2  ;;  %v134_v8 = vld [vmem:[#allocation5 + $0x168] sm:$0xff]  ;;  %v117_v9 = vld [vmem:[#allocation5 + $0xe0] sm:$0xff]  ;;  %v116_v12 = vld [vmem:[#allocation5 + $0xd8] sm:$0xff]  ;;  %s795_s12 = scalar_lea.vmem %s533_s11, 256  ;;  %p800_p2 = scmp.lt.s32.totalorder %s533_s11, %s533_s11 }
  0x29   :  { %660 = vmatpush3.msra.mxu1 %v136_v4  ;;  %550 = vmatpush3.msra.mxu0 %v103_v3  ;;  %v101_v10 = vld [vmem:[#allocation5 + $0x60] sm:$0xff]  ;;  %v100_v13 = vld [vmem:[#allocation5 + $0x58] sm:$0xff]  ;;  %v115_v15 = vld [vmem:[#allocation5 + $0xd0] sm:$0xff]  ;;  %p796_p1 = scmp.ne.s32.totalorder %s533_s11, %s795_s12  ;;  %p801_p3 = scmp.lt.s32.totalorder %s795_s12, %s795_s12 }
  0x2a   :  { %661 = vmatprep.subr.mxu1 %v135_v6  ;;  %551 = vmatprep.subr.mxu0 %v118_v5  ;;  %v133_v11 = vld [vmem:[#allocation5 + $0x160] sm:$0xff]  ;;  %v132_v14 = vld [vmem:[#allocation5 + $0x158] sm:$0xff]  ;;  %v99_v16 = vld [vmem:[#allocation5 + $0x50] sm:$0xff] }
  0x2b   :  { %662 = vmatpush3.msra.mxu1 %v135_v6  ;;  %552 = vmatpush3.msra.mxu0 %v102_v7  ;;  %v131_v17 = vld [vmem:[#allocation5 + $0x150] sm:$0xff]  ;;  %v114_v18 = vld [vmem:[#allocation5 + $0xc8] sm:$0xff]  ;;  %v113_v21 = vld [vmem:[#allocation5 + $0xc0] sm:$0xff]  ;;  %p802_p4 = por %p801_p3, %p800_p2 }
  0x2c   :  { %663 = vmatprep.subr.mxu1 %v134_v8  ;;  %553 = vmatprep.subr.mxu0 %v117_v9  ;;  %v98_v19 = vld [vmem:[#allocation5 + $0x48] sm:$0xff]  ;;  %v97_v22 = vld [vmem:[#allocation5 + $0x40] sm:$0xff]  ;;  %v112_v24 = vld [vmem:[#allocation5 + $0xb8] sm:$0xff] }
  0x2d   :  { %664 = vmatpush3.msra.mxu1 %v134_v8  ;;  %554 = vmatpush3.msra.mxu0 %v101_v10  ;;  %v130_v20 = vld [vmem:[#allocation5 + $0x148] sm:$0xff]  ;;  %v129_v23 = vld [vmem:[#allocation5 + $0x140] sm:$0xff]  ;;  %v96_v25 = vld [vmem:[#allocation5 + $0x38] sm:$0xff]  ;;  %p803_p5 = pnand %p802_p4, %p796_p1 }
  0x2e   :  { %665 = vmatprep.subr.mxu1 %v133_v11  ;;  %555 = vmatprep.subr.mxu0 %v116_v12  ;;  %v128_v26 = vld [vmem:[#allocation5 + $0x138] sm:$0xff]  ;;  %v875_v27 = vld [vmem:[#allocation2] sm:$0xff]  ;;  %v110_v34 = vld [vmem:[#allocation5 + $0xa8] sm:$0xff] }
  0x2f   :  { %666 = vmatpush3.msra.mxu1 %v133_v11  ;;  %556 = vmatpush3.msra.mxu0 %v100_v13  ;;  %v877_v28 = vld [vmem:[#allocation2 + $0x8] sm:$0xff]  ;;  %v111_v29 = vld [vmem:[#allocation5 + $0xb0] sm:$0xff]  ;;  %v69_v31 = vrot.slane %v875_v27, 7  ;;  %v94_v35 = vld [vmem:[#allocation5 + $0x28] sm:$0xff] }
  0x30   :  { %667 = vmatprep.subr.mxu1 %v132_v14  ;;  %557 = vmatprep.subr.mxu0 %v115_v15  ;;  %v65_v30 = vrot.slane %v877_v28, 7  ;;  %v95_v32 = vld [vmem:[#allocation5 + $0x30] sm:$0xff]  ;;  %v126_v36 = vld [vmem:[#allocation5 + $0x128] sm:$0xff]  ;;  %v109_v39 = vld [vmem:[#allocation5 + $0xa0] sm:$0xff] }
  0x31   :  { %668 = vmatpush3.msra.mxu1 %v132_v14  ;;  %558 = vmatpush3.msra.mxu0 %v99_v16  ;;  %v127_v33 = vld [vmem:[#allocation5 + $0x130] sm:$0xff]  ;;  %v93_v40 = vld [vmem:[#allocation5 + $0x20] sm:$0xff]  ;;  %v108_v42 = vld [vmem:[#allocation5 + $0x98] sm:$0xff] }
  0x32   :  { %669 = vmatprep.subr.mxu1 %v131_v17  ;;  %559 = vmatprep.subr.mxu0 %v114_v18  ;;  %v882_v37 = vsel %vm68_vm0, %v69_v31, %v65_v30  ;;  %v73_v38 = vsel %vm68_vm0, %v65_v30, %v69_v31  ;;  %v125_v41 = vld [vmem:[#allocation5 + $0x120] sm:$0xff]  ;;  %v92_v45 = vld [vmem:[#allocation5 + $0x18] sm:$0xff]  ;;  %v107_v47 = vld [vmem:[#allocation5 + $0x90] sm:$0xff] }
  0x33   :  { %670 = vmatpush3.msra.mxu1 %v131_v17  ;;  %560 = vmatpush3.msra.mxu0 %v98_v19  ;;  %v76_v43 = vrot.slane %v73_v38, 1  ;;  %v77_v44 = vrot.slane %v882_v37, 1  ;;  %v124_v46 = vld [vmem:[#allocation5 + $0x118] sm:$0xff]  ;;  %v91_v48 = vld [vmem:[#allocation5 + $0x10] sm:$0xff]  ;;  %v106_v50 = vld [vmem:[#allocation5 + $0x88] sm:$0xff]  ;;  %v83_v55 = vrot.slane %v73_v38, 2 }
  0x34   :  { %671 = vmatprep.subr.mxu1 %v130_v20  ;;  %561 = vmatprep.subr.mxu0 %v113_v21  ;;  %v123_v49 = vld [vmem:[#allocation5 + $0x110] sm:$0xff]  ;;  %v90_v52 = vld [vmem:[#allocation5 + $0x8] sm:$0xff]  ;;  %v105_v53 = vld [vmem:[#allocation5 + $0x80] sm:$0xff]  ;;  %v84_v56 = vrot.slane %v882_v37, 2 }
  0x35   :  { %672 = vmatpush3.msra.mxu1 %v130_v20  ;;  %562 = vmatpush3.msra.mxu0 %v97_v22  ;;  %v78_v51 = vsel %vm75_vm1, %v76_v43, %v77_v44  ;;  %v122_v54 = vld [vmem:[#allocation5 + $0x108] sm:$0xff]  ;;  %v89_v57 = vld [vmem:[#allocation5] sm:$0xff]  ;;  %v79_v59 = vsel %vm75_vm1, %v77_v44, %v76_v43  ;;  %v349_v61 = vld [vmem:[#allocation7 + $0xf8] sm:$0xff] }
  0x36   :  { %673 = vmatprep.subr.mxu1 %v129_v23  ;;  %563 = vmatprep.subr.mxu0 %v112_v24  ;;  %v121_v58 = vld [vmem:[#allocation5 + $0x100] sm:$0xff]  ;;  %v85_v60 = vsel %vm82_vm2, %v83_v55, %v84_v56  ;;  %v86_v62 = vsel %vm82_vm2, %v84_v56, %v83_v55  ;;  %v365_v63 = vld [vmem:[#allocation7 + $0x178] sm:$0xff]  ;;  %v364_v1 = vld [vmem:[#allocation7 + $0x170] sm:$0xff] }
  0x37   :  { %674 = vmatpush3.msra.mxu1 %v129_v23  ;;  %564 = vmatpush3.msra.mxu0 %v96_v25  ;;  %v333_v0 = vld [vmem:[#allocation7 + $0x78] sm:$0xff]  ;;  %v348_v2 = vld [vmem:[#allocation7 + $0xf0] sm:$0xff]  ;;  %v363_v4 = vld [vmem:[#allocation7 + $0x168] sm:$0xff] }
  0x38   :  { %675 = vmatprep.subr.mxu1 %v128_v26  ;;  %565 = vmatprep.subr.mxu0 %v111_v29  ;;  %v332_v3 = vld [vmem:[#allocation7 + $0x70] sm:$0xff]  ;;  %v347_v5 = vld [vmem:[#allocation7 + $0xe8] sm:$0xff]  ;;  %v362_v7 = vld [vmem:[#allocation7 + $0x160] sm:$0xff] }
  0x39   :  { %676 = vmatpush3.msra.mxu1 %v128_v26  ;;  %566 = vmatpush3.msra.mxu0 %v95_v32  ;;  %v331_v6 = vld [vmem:[#allocation7 + $0x68] sm:$0xff]  ;;  %v346_v8 = vld [vmem:[#allocation7 + $0xe0] sm:$0xff]  ;;  %v361_v10 = vld [vmem:[#allocation7 + $0x158] sm:$0xff] }
  0x3a   :  { %677 = vmatprep.subr.mxu1 %v127_v33  ;;  %567 = vmatprep.subr.mxu0 %v110_v34  ;;  %v330_v9 = vld [vmem:[#allocation7 + $0x60] sm:$0xff]  ;;  %v345_v11 = vld [vmem:[#allocation7 + $0xd8] sm:$0xff]  ;;  %v344_v13 = vld [vmem:[#allocation7 + $0xd0] sm:$0xff] }
  0x3b   :  { %678 = vmatpush3.msra.mxu1 %v127_v33  ;;  %568 = vmatpush3.msra.mxu0 %v94_v35  ;;  %v329_v12 = vld [vmem:[#allocation7 + $0x58] sm:$0xff]  ;;  %v360_v14 = vld [vmem:[#allocation7 + $0x150] sm:$0xff]  ;;  %v343_v16 = vld [vmem:[#allocation7 + $0xc8] sm:$0xff] }
  0x3c   :  { %679 = vmatprep.subr.mxu1 %v126_v36  ;;  %569 = vmatprep.subr.mxu0 %v109_v39  ;;  %v328_v15 = vld [vmem:[#allocation7 + $0x50] sm:$0xff]  ;;  %v359_v17 = vld [vmem:[#allocation7 + $0x148] sm:$0xff]  ;;  %v342_v19 = vld [vmem:[#allocation7 + $0xc0] sm:$0xff] }
  0x3d   :  { %680 = vmatpush3.msra.mxu1 %v126_v36  ;;  %570 = vmatpush3.msra.mxu0 %v93_v40  ;;  %v327_v18 = vld [vmem:[#allocation7 + $0x48] sm:$0xff]  ;;  %v358_v20 = vld [vmem:[#allocation7 + $0x140] sm:$0xff]  ;;  %v341_v22 = vld [vmem:[#allocation7 + $0xb8] sm:$0xff] }
  0x3e   :  { %681 = vmatprep.subr.mxu1 %v125_v41  ;;  %571 = vmatprep.subr.mxu0 %v108_v42  ;;  %v326_v21 = vld [vmem:[#allocation7 + $0x40] sm:$0xff]  ;;  %v357_v23 = vld [vmem:[#allocation7 + $0x138] sm:$0xff]  ;;  %v340_v25 = vld [vmem:[#allocation7 + $0xb0] sm:$0xff] }
  0x3f   :  { %682 = vmatpush3.msra.mxu1 %v125_v41  ;;  %572 = vmatpush3.msra.mxu0 %v92_v45  ;;  %v325_v24 = vld [vmem:[#allocation7 + $0x38] sm:$0xff]  ;;  %v356_v26 = vld [vmem:[#allocation7 + $0x130] sm:$0xff]  ;;  %v339_v30 = vld [vmem:[#allocation7 + $0xa8] sm:$0xff] }
  0x40   :  { %683 = vmatprep.subr.mxu1 %v124_v46  ;;  %573 = vmatprep.subr.mxu0 %v107_v47  ;;  %v324_v29 = vld [vmem:[#allocation7 + $0x30] sm:$0xff]  ;;  %v355_v31 = vld [vmem:[#allocation7 + $0x128] sm:$0xff]  ;;  %v338_v33 = vld [vmem:[#allocation7 + $0xa0] sm:$0xff] }
  0x41   :  { %684 = vmatpush3.msra.mxu1 %v124_v46  ;;  %574 = vmatpush3.msra.mxu0 %v91_v48  ;;  %v323_v32 = vld [vmem:[#allocation7 + $0x28] sm:$0xff]  ;;  %v354_v34 = vld [vmem:[#allocation7 + $0x120] sm:$0xff]  ;;  %v337_v36 = vld [vmem:[#allocation7 + $0x98] sm:$0xff] }
  0x42   :  { %685 = vmatprep.subr.mxu1 %v123_v49  ;;  %575 = vmatprep.subr.mxu0 %v106_v50  ;;  %v322_v35 = vld [vmem:[#allocation7 + $0x20] sm:$0xff]  ;;  %v336_v39 = vld [vmem:[#allocation7 + $0x90] sm:$0xff]  ;;  %v335_v42 = vld [vmem:[#allocation7 + $0x88] sm:$0xff] }
  0x43   :  { %208 = vmatprep.mubr.f32.mxu0 %v78_v51  ;;  %576 = vmatpush3.msra.mxu0 %v90_v52  ;;  %v352_v40 = vld [vmem:[#allocation7 + $0x110] sm:$0xff]  ;;  %v351_v43 = vld [vmem:[#allocation7 + $0x108] sm:$0xff]  ;;  %v334_v45 = vld [vmem:[#allocation7 + $0x80] sm:$0xff] }
  0x44   :  { %686 = vmatpush3.msra.mxu1 %v123_v49  ;;  %577 = vmatprep.subr.mxu0 %v105_v53  ;;  %v320_v41 = vld [vmem:[#allocation7 + $0x10] sm:$0xff]  ;;  %v319_v44 = vld [vmem:[#allocation7 + $0x8] sm:$0xff]  ;;  %v350_v46 = vld [vmem:[#allocation7 + $0x100] sm:$0xff] }
  0x45   :  { %687 = vmatprep.subr.mxu1 %v122_v54  ;;  %578 = vmatpush3.msra.mxu0 %v89_v57  ;;  %v318_v47 = vld [vmem:[#allocation7] sm:$0xff]  ;;  %v545_v50 = vld [vmem:[%s914_s2] ss:$0 sm:$0xff] }
  0x46   :  { %688 = vmatpush3.msra.mxu1 %v122_v54  ;;  %209 = vmatmul.mubr.f32.vlgmr.msra.gmra.mxu0 %v73_v38  ;;  %v321_v38 = vld [vmem:[#allocation7 + $0x18] sm:$0xff] }
  0x47   :  { %689 = vmatprep.subr.mxu1 %v121_v58  ;;  %213 = vmatprep.mubr.f32.mxu0 %v79_v59 }
  0x48   :  { %690 = vmatpush3.msra.mxu1 %v121_v58  ;;  %691 = vmatprep.mubr.f32.mxu1 %v85_v60 }
  0x49   :  { %603 = vmatprep.subr.mxu0 %v349_v61  ;;  %692 = vmatmul.mubr.f32.vlgmr.msra.gmra.mxu1 %v86_v62 }
  0x4a   :  { %694 = vmatprep.subr.mxu1 %v365_v63  ;;  %214 = vmatmul.mubr.f32.gmra.mxu0 %v882_v37  ;;  %v353_v37 = vld [vmem:[#allocation7 + $0x118] sm:$0xff] }
  0x4b   :  { %695 = vmatpush3.msra.mxu1 %v365_v63  ;;  %604 = vmatpush3.msra.mxu0 %v333_v0 }
  0x4c   :  { %696 = vmatprep.subr.mxu1 %v364_v1  ;;  %605 = vmatprep.subr.mxu0 %v348_v2 }
  0x4d   :  { %697 = vmatpush3.msra.mxu1 %v364_v1  ;;  %606 = vmatpush3.msra.mxu0 %v332_v3 }
  0x4e   :  { %698 = vmatprep.subr.mxu1 %v363_v4  ;;  %607 = vmatprep.subr.mxu0 %v347_v5 }
  0x4f   :  { %699 = vmatpush3.msra.mxu1 %v363_v4  ;;  %608 = vmatpush3.msra.mxu0 %v331_v6 }
  0x50   :  { %700 = vmatprep.subr.mxu1 %v362_v7  ;;  %609 = vmatprep.subr.mxu0 %v346_v8 }
  0x51   :  { %701 = vmatpush3.msra.mxu1 %v362_v7  ;;  %610 = vmatpush3.msra.mxu0 %v330_v9 }
  0x52   :  { %702 = vmatprep.subr.mxu1 %v361_v10  ;;  %611 = vmatprep.subr.mxu0 %v345_v11 }
  0x53   :  { %703 = vmatpush3.msra.mxu1 %v361_v10  ;;  %612 = vmatpush3.msra.mxu0 %v329_v12 }
  0x54   :  { %613 = vmatprep.subr.mxu0 %v344_v13  ;;  %704 = vmatprep.subr.mxu1 %v360_v14 }
  0x55   :  { %614 = vmatpush3.msra.mxu0 %v328_v15  ;;  %705 = vmatpush3.msra.mxu1 %v360_v14  ;;  %v546_v14 = vld [vmem:[%s916_s4] ss:$0 sm:$0xff] }
  0x56   :  { %615 = vmatprep.subr.mxu0 %v343_v16  ;;  %706 = vmatprep.subr.mxu1 %v359_v17 }
  0x57   :  { %616 = vmatpush3.msra.mxu0 %v327_v18  ;;  %707 = vmatpush3.msra.mxu1 %v359_v17 }
  0x58   :  { %617 = vmatprep.subr.mxu0 %v342_v19  ;;  %708 = vmatprep.subr.mxu1 %v358_v20 }
  0x59   :  { %618 = vmatpush3.msra.mxu0 %v326_v21  ;;  %709 = vmatpush3.msra.mxu1 %v358_v20 }
  0x5a   :  { %619 = vmatprep.subr.mxu0 %v341_v22  ;;  %710 = vmatprep.subr.mxu1 %v357_v23 }
  0x5b   :  { %620 = vmatpush3.msra.mxu0 %v325_v24  ;;  %711 = vmatpush3.msra.mxu1 %v357_v23 }
  0x5c   :  { %621 = vmatprep.subr.mxu0 %v340_v25  ;;  %712 = vmatprep.subr.mxu1 %v356_v26 }
  0x5d   :  { %622 = vmatpush3.msra.mxu0 %v324_v29  ;;  %713 = vmatpush3.msra.mxu1 %v356_v26 }
  0x5e   :  { %623 = vmatprep.subr.mxu0 %v339_v30  ;;  %714 = vmatprep.subr.mxu1 %v355_v31 }
  0x5f   :  { %624 = vmatpush3.msra.mxu0 %v323_v32  ;;  %715 = vmatpush3.msra.mxu1 %v355_v31 }
  0x60   :  { %625 = vmatprep.subr.mxu0 %v338_v33  ;;  %716 = vmatprep.subr.mxu1 %v354_v34 }
  0x61   :  { %626 = vmatpush3.msra.mxu0 %v322_v35  ;;  %717 = vmatpush3.msra.mxu1 %v354_v34 }
  0x62   :  { %627 = vmatprep.subr.mxu0 %v337_v36  ;;  %718 = vmatprep.subr.mxu1 %v353_v37 }
  0x63   :  { %628 = vmatpush3.msra.mxu0 %v321_v38  ;;  %719 = vmatpush3.msra.mxu1 %v353_v37 }
  0x64   :  { %629 = vmatprep.subr.mxu0 %v336_v39  ;;  %720 = vmatprep.subr.mxu1 %v352_v40 }
  0x65   :  { %630 = vmatpush3.msra.mxu0 %v320_v41  ;;  %721 = vmatpush3.msra.mxu1 %v352_v40 }
  0x66   :  { %631 = vmatprep.subr.mxu0 %v335_v42  ;;  %722 = vmatprep.subr.mxu1 %v351_v43 }
  0x67   :  { %632 = vmatpush3.msra.mxu0 %v319_v44  ;;  %723 = vmatpush3.msra.mxu1 %v351_v43 }
  0x68   :  { %633 = vmatprep.subr.mxu0 %v334_v45  ;;  %724 = vmatprep.subr.mxu1 %v350_v46 }
  0x69   :  { %634 = vmatpush3.msra.mxu0 %v318_v47  ;;  %725 = vmatpush3.msra.mxu1 %v350_v46 }
 0x106   :  { %v579_v48 = vpop.f32.mrf.mxu0 }
 0x108   :  { %v580_v49 = vpop.f32.mrf.mxu0 }
 0x109   :  { %v581_v51 = vadd.f32 %v580_v49, %v579_v48  ;;  %v693_v52 = vpop.f32.mrf.mxu1 }
 0x10a   :  { %v582_v53 = vpop.f32.mrf.mxu0 }
 0x10b   :  { %v211_v54 = vadd.f32 %v581_v51, %v545_v50  ;;  %v285_v55 = vpop.f32.mrf.mxu1 }
 0x10c   :  { %v583_v56 = vpop.f32.mrf.mxu0 }
 0x10d   :  { %v584_v57 = vadd.f32 %v583_v56, %v582_v53  ;;  %v286_v58 = vadd.f32 %v285_v55, %v211_v54 }
 0x10f   :  { %v216_v59 = vadd.f32 %v584_v57, %v545_v50  ;;  %v294_v61 = vmax.f32 %v286_v58, 0.0 }
 0x111   :  { %v291_v60 = vadd.f32 %v693_v52, %v216_v59  ;;  %v300_v0 = vrot.slane %v294_v61, 7 }
 0x113   :  { %v295_v62 = vmax.f32 %v291_v60, 0.0 }
 0x115   :  { %v297_v63 = vrot.slane %v295_v62, 7 }
 0x117   :  { %v301_v1 = vsel %vm68_vm0, %v300_v0, %v297_v63  ;;  %v304_v2 = vsel %vm68_vm0, %v297_v63, %v300_v0 }
 0x118   :  { %v306_v3 = vrot.slane %v304_v2, 1  ;;  %v307_v4 = vrot.slane %v301_v1, 1  ;;  %v312_v5 = vrot.slane %v304_v2, 2  ;;  %v313_v6 = vrot.slane %v301_v1, 2 }
 0x11a   :  { %v308_v7 = vsel %vm75_vm1, %v306_v3, %v307_v4  ;;  %v314_v8 = vsel %vm82_vm2, %v312_v5, %v313_v6  ;;  %v315_v9 = vsel %vm82_vm2, %v313_v6, %v312_v5  ;;  %v309_v10 = vsel %vm75_vm1, %v307_v4, %v306_v3 }
 0x11b   :  { %437 = vmatprep.mubr.f32.mxu0 %v308_v7  ;;  %726 = vmatprep.mubr.f32.mxu1 %v314_v8 }
 0x11c   :  { %438 = vmatmul.mubr.f32.vlgmr.msra.gmra.mxu0 %v304_v2  ;;  %727 = vmatmul.mubr.f32.vlgmr.msra.gmra.mxu1 %v315_v9 }
 0x11d   :  { %442 = vmatprep.mubr.f32.mxu0 %v309_v10 }
 0x120   :  { %443 = vmatmul.mubr.f32.gmra.mxu0 %v301_v1 }
 0x1dc   :  { %v635_v11 = vpop.f32.mrf.mxu0  ;;  %v728_v12 = vpop.f32.mrf.mxu1 }
 0x1de   :  { %v636_v13 = vpop.f32.mrf.mxu0  ;;  %v514_v18 = vpop.f32.mrf.mxu1 }
 0x1df   :  { %v637_v15 = vadd.f32 %v636_v13, %v635_v11 }
 0x1e0   :  { %v638_v16 = vpop.f32.mrf.mxu0 }
 0x1e1   :  { %v440_v17 = vadd.f32 %v637_v15, %v546_v14 }
 0x1e2   :  { %v639_v19 = vpop.f32.mrf.mxu0 }
 0x1e3   :  { %v515_v20 = vadd.f32 %v514_v18, %v440_v17  ;;  %v640_v21 = vadd.f32 %v639_v19, %v638_v16 }
 0x1e5   :  { %v523_v22 = vadd.f32 %v515_v20, %v875_v27  ;;  %v445_v23 = vadd.f32 %v640_v21, %v546_v14 }
 0x1e7   :  { %525 = vst [vmem:[#allocation8] sm:$0xff] %v523_v22  ;;  %v520_v24 = vadd.f32 %v728_v12, %v445_v23 }
 0x1e9   :  { %v524_v25 = vadd.f32 %v520_v24, %v877_v28 }
 0x1eb   :  { %526 = vst [vmem:[#allocation8 + $0x8] sm:$0xff] %v524_v25 }
 0x1ec   :  { %806 = shalt.err (!%p803_p5)
}
 0x1ed   :  { %538 = dma.vmem_to_hbm [thread:$0]  %s533_s11, 256, %s917_s5, [#allocation4], %s823_s23, %s823_s23, %s824_s24  }
 0x1ee   :  { %819 = dma.done.wait [#allocation4], 256  }
 0x1ef   :  { %820 = vsyncadd [#allocation4], 4294967040 }
 0x1f0   :  { %542 = vsyncpa [#allocation3], 1 }
 0x1f1   :  { %543 = vsyncpa [#allocation6], 1 }
 0x1f2   :  { %544 = vsyncpa [#allocation4], 1 }

</bundles_post_ra>
